<compile_context>
chip_gen: v7x
topology: tpu7x:2x2x1
jax: 0.10.0
libtpu: 0.0.40
codegen_flags: <defaults>
</compile_context>

<pallas_src>
import functools

import jax
import jax.numpy as jnp
from jax.experimental import pallas as pl
from jax.experimental.pallas import tpu as pltpu

_LANE = 128


def _freq_encoder_kernel(x_ref, o_ref, *, freq_bands, include_input, use_double_angle):
    """x_ref: [D, tn] (lane-dense), o_ref: [out_dim, tn] (lane-dense)."""
    x32 = x_ref[...].astype(jnp.float32)          # upcast once; compute in f32
    parts = []
    if include_input:
        parts.append(x32)
    if freq_bands:
        if use_double_angle:
            # Base band on the EUP, higher bands via double-angle on the VPU.
            s = jnp.sin(x32 * jnp.float32(freq_bands[0]))
            c = jnp.cos(x32 * jnp.float32(freq_bands[0]))
            parts.append(s)
            parts.append(c)
            for _ in range(len(freq_bands) - 1):
                s, c = 2.0 * s * c, 1.0 - 2.0 * s * s
                parts.append(s)
                parts.append(c)
        else:
            for freq in freq_bands:
                xf = x32 * jnp.float32(freq)
                parts.append(jnp.sin(xf))
                parts.append(jnp.cos(xf))
    # One unmasked whole-block store (sublane packing handled by the concat
    # on the XLU) instead of many 3-row masked stores.
    tile = parts[0] if len(parts) == 1 else jnp.concatenate(parts, axis=0)
    o_ref[...] = tile.astype(o_ref.dtype)


class FreqEncoderPallas:
    """JAX/Pallas equivalent of FreqEncoder_torch (periodic_fns = (sin, cos))."""

    def __init__(self, input_dim, max_freq_log2, N_freqs,
                 log_sampling=True, include_input=True):
        self.input_dim = input_dim
        self.include_input = include_input
        self.output_dim = 0
        if include_input:
            self.output_dim += input_dim
        self.output_dim += input_dim * N_freqs * 2

        # Match torch.linspace semantics (N_freqs == 1 -> single band at 2**0).
        if N_freqs <= 0:
            bands = []
        elif N_freqs == 1:
            bands = [1.0]
        elif log_sampling:
            bands = [2.0 ** (max_freq_log2 * i / (N_freqs - 1))
                     for i in range(N_freqs)]
        else:
            lo, hi = 2.0 ** 0, 2.0 ** max_freq_log2
            bands = [lo + (hi - lo) * i / (N_freqs - 1)
                     for i in range(N_freqs)]
        self.freq_bands = bands
        # Double-angle recurrence is exact-form only for exactly x2-spaced bands.
        self._pow2_spaced = (len(bands) >= 2 and
                             all(bands[i + 1] == 2.0 * bands[i]
                                 for i in range(len(bands) - 1)))

    def __call__(self, x, *, tile_n=32768, out_dtype=None,
                 features_first=False, use_double_angle=None):
        """x: [..., input_dim] -> [..., output_dim]  (or [output_dim, ...] if
        features_first=True, which skips the output transpose entirely)."""
        orig_shape = x.shape
        D = orig_shape[-1]
        assert D == self.input_dim, (D, self.input_dim)
        out_dim = self.output_dim
        out_dtype = jnp.dtype(x.dtype if out_dtype is None else out_dtype)
        if use_double_angle is None:
            use_double_angle = self._pow2_spaced
        else:
            use_double_angle = bool(use_double_angle) and self._pow2_spaced

        x2d = x.reshape(-1, D)
        N = x2d.shape[0]
        xbytes = x2d.dtype.itemsize
        obytes = out_dtype.itemsize

        # ---- lane-tile selection -------------------------------------------
        n_min_pad = pl.cdiv(N, _LANE) * _LANE
        # Cap so double-buffered in+out blocks stay under ~14 MiB -> runs at the
        # default scoped-VMEM limit on v5e (16 MiB) as well as v6e/v7x (32 MiB).
        vmem_budget = 14 * 1024 * 1024
        per_lane_bytes = 2 * (D * xbytes + out_dim * obytes)
        tn_cap = max(_LANE, (vmem_budget // per_lane_bytes) // _LANE * _LANE)
        tn = max(_LANE, (int(tile_n) // _LANE) * _LANE)
        tn = min(tn, tn_cap, n_min_pad)
        # v7x megacore: guarantee >= 2 grid steps when there are >= 2 lane tiles
        # of data, so the "parallel" axis can shard across both TensorCores.
        if n_min_pad >= 2 * _LANE and n_min_pad <= tn:
            tn = max(_LANE, (n_min_pad // (2 * _LANE)) * _LANE)
        n_pad = pl.cdiv(N, tn) * tn

        # ---- input layout plumbing (input traffic is only D/out_dim of total) ----
        xt = x2d.T                                   # [D, N] lane-dense
        if n_pad != N:
            xt = jnp.pad(xt, ((0, 0), (0, n_pad - N)))

        kernel = functools.partial(
            _freq_encoder_kernel,
            freq_bands=tuple(self.freq_bands),
            include_input=self.include_input,
            use_double_angle=use_double_angle,
        )

        F = len(self.freq_bands)
        n_trans = 2 * D * (1 if (use_double_angle and F) else F) * n_pad
        flops = n_pad * D * (2 * F + 6 * max(F - 1, 0))   # rough: scales + recurrences
        bytes_acc = n_pad * (D * xbytes + out_dim * obytes)

        out_t = pl.pallas_call(
            kernel,
            out_shape=jax.ShapeDtypeStruct((out_dim, n_pad), out_dtype),
            grid_spec=pltpu.PrefetchScalarGridSpec(
                num_scalar_prefetch=0,
                grid=(n_pad // tn,),
                in_specs=[pl.BlockSpec((D, tn), lambda i: (0, i))],
                out_specs=pl.BlockSpec((out_dim, tn), lambda i: (0, i)),
            ),
            compiler_params=pltpu.CompilerParams(
                dimension_semantics=("parallel",),
            ),
            cost_estimate=pl.CostEstimate(
                flops=int(flops),
                transcendentals=int(n_trans),
                bytes_accessed=int(bytes_acc),
            ),
        )(xt)                                        # [out_dim, n_pad]

        if features_first:
            out = out_t[:, :N] if n_pad != N else out_t
            return out.reshape(out_dim, *orig_shape[:-1])

        # Torch-compatible layout; this transpose re-reads/re-writes the full
        # output — consumers that can use [out_dim, ...] should prefer
        # features_first=True.
        out = out_t[:, :N].T                         # [N, out_dim]
        return out.reshape(*orig_shape[:-1], out_dim)


def _reference_freq_encode(x, freq_bands, include_input):
    out = []
    if include_input:
        out.append(x)
    for freq in freq_bands:
        out.append(jnp.sin(x * freq))
        out.append(jnp.cos(x * freq))
    return jnp.concatenate(out, axis=-1)


if __name__ == "__main__":
    # Case 1: standard NeRF xyz encoding (D=3, exactly x2-spaced bands -> the
    # double-angle fast path), ragged N to exercise padding.
    key = jax.random.PRNGKey(0)
    N, D = 1000, 3
    x = jax.random.normal(key, (N, D), dtype=jnp.float32)
    enc = FreqEncoderPallas(input_dim=D, max_freq_log2=5, N_freqs=6,
                            log_sampling=True, include_input=True)
    y_ref = _reference_freq_encode(x, enc.freq_bands, enc.include_input)

    y = jax.block_until_ready(enc(x))                      # default tile path
    assert y.shape == (N, enc.output_dim), (y.shape, enc.output_dim)
    assert jnp.allclose(y, y_ref, atol=1e-4, rtol=1e-5), "mismatch (double-angle path)"

    y_small = jax.block_until_ready(enc(x, tile_n=256))    # multi-step grid path
    assert jnp.allclose(y_small, y_ref, atol=1e-4, rtol=1e-5), "mismatch (multi-tile)"

    y_direct = jax.block_until_ready(enc(x, use_double_angle=False))
    assert jnp.allclose(y_direct, y_ref, atol=1e-4, rtol=1e-5), "mismatch (direct path)"

    # features_first fast path: no wrapper output transpose, layout [out_dim, N].
    y_ff = jax.block_until_ready(enc(x, features_first=True))
    assert y_ff.shape == (enc.output_dim, N), y_ff.shape
    assert jnp.allclose(y_ff, y_ref.T, atol=1e-4, rtol=1e-5), "mismatch (features_first)"

    # Case 2: batched leading dims, D=4, non-power-of-2 bands -> direct sin/cos path.
    x2 = jax.random.normal(jax.random.PRNGKey(1), (2, 8, 4), dtype=jnp.float32)
    enc2 = FreqEncoderPallas(input_dim=4, max_freq_log2=4, N_freqs=5,
                             log_sampling=False, include_input=True)
    y2 = jax.block_until_ready(enc2(x2))
    y2_ref = _reference_freq_encode(x2, enc2.freq_bands, enc2.include_input)
    assert y2.shape == (2, 8, enc2.output_dim), (y2.shape, enc2.output_dim)
    assert jnp.allclose(y2, y2_ref, atol=1e-4, rtol=1e-5), "mismatch (case 2)"

    print("KERNEL_OK")
</pallas_src>

<mosaic_0001>
module attributes {stable_mosaic.version = 11 : i64} {
  func.func @_freq_encoder_kernel(%arg0: i32, %arg1: memref<3x512xf32, #tpu.memory_space<vmem>>, %arg2: memref<39x512xf32, #tpu.memory_space<vmem>>) attributes {dimension_semantics = [#tpu.dimension_semantics<parallel>], iteration_bounds = array<i64: 2>, scalar_prefetch = 0 : i64, scratch_operands = 0 : i64, tpu.core_type = #tpu.core_type<tc>, window_params = [{transform_indices = @transform_0, window_bounds = array<i64: 3, 512>}, {transform_indices = @transform_1, window_bounds = array<i64: 39, 512>}]} {
    %c0 = arith.constant 0 : index
    %c0_0 = arith.constant 0 : index
    %0 = vector.load %arg1[%c0, %c0_0] : memref<3x512xf32, #tpu.memory_space<vmem>>, vector<3x512xf32>
    %cst = arith.constant 1.000000e+00 : f32
    %1 = vector.broadcast %cst : f32 to vector<3x512xf32>
    %2 = arith.mulf %0, %1 : vector<3x512xf32>
    %3 = math.sin %2 : vector<3x512xf32>
    %cst_1 = arith.constant 1.000000e+00 : f32
    %4 = vector.broadcast %cst_1 : f32 to vector<3x512xf32>
    %5 = arith.mulf %0, %4 : vector<3x512xf32>
    %6 = math.cos %5 : vector<3x512xf32>
    %cst_2 = arith.constant 2.000000e+00 : f32
    %7 = vector.broadcast %cst_2 : f32 to vector<3x512xf32>
    %8 = arith.mulf %7, %3 : vector<3x512xf32>
    %9 = arith.mulf %8, %6 : vector<3x512xf32>
    %cst_3 = arith.constant 2.000000e+00 : f32
    %10 = vector.broadcast %cst_3 : f32 to vector<3x512xf32>
    %11 = arith.mulf %10, %3 : vector<3x512xf32>
    %12 = arith.mulf %11, %3 : vector<3x512xf32>
    %cst_4 = arith.constant 1.000000e+00 : f32
    %13 = vector.broadcast %cst_4 : f32 to vector<3x512xf32>
    %14 = arith.subf %13, %12 : vector<3x512xf32>
    %cst_5 = arith.constant 2.000000e+00 : f32
    %15 = vector.broadcast %cst_5 : f32 to vector<3x512xf32>
    %16 = arith.mulf %15, %9 : vector<3x512xf32>
    %17 = arith.mulf %16, %14 : vector<3x512xf32>
    %cst_6 = arith.constant 2.000000e+00 : f32
    %18 = vector.broadcast %cst_6 : f32 to vector<3x512xf32>
    %19 = arith.mulf %18, %9 : vector<3x512xf32>
    %20 = arith.mulf %19, %9 : vector<3x512xf32>
    %cst_7 = arith.constant 1.000000e+00 : f32
    %21 = vector.broadcast %cst_7 : f32 to vector<3x512xf32>
    %22 = arith.subf %21, %20 : vector<3x512xf32>
    %cst_8 = arith.constant 2.000000e+00 : f32
    %23 = vector.broadcast %cst_8 : f32 to vector<3x512xf32>
    %24 = arith.mulf %23, %17 : vector<3x512xf32>
    %25 = arith.mulf %24, %22 : vector<3x512xf32>
    %cst_9 = arith.constant 2.000000e+00 : f32
    %26 = vector.broadcast %cst_9 : f32 to vector<3x512xf32>
    %27 = arith.mulf %26, %17 : vector<3x512xf32>
    %28 = arith.mulf %27, %17 : vector<3x512xf32>
    %cst_10 = arith.constant 1.000000e+00 : f32
    %29 = vector.broadcast %cst_10 : f32 to vector<3x512xf32>
    %30 = arith.subf %29, %28 : vector<3x512xf32>
    %cst_11 = arith.constant 2.000000e+00 : f32
    %31 = vector.broadcast %cst_11 : f32 to vector<3x512xf32>
    %32 = arith.mulf %31, %25 : vector<3x512xf32>
    %33 = arith.mulf %32, %30 : vector<3x512xf32>
    %cst_12 = arith.constant 2.000000e+00 : f32
    %34 = vector.broadcast %cst_12 : f32 to vector<3x512xf32>
    %35 = arith.mulf %34, %25 : vector<3x512xf32>
    %36 = arith.mulf %35, %25 : vector<3x512xf32>
    %cst_13 = arith.constant 1.000000e+00 : f32
    %37 = vector.broadcast %cst_13 : f32 to vector<3x512xf32>
    %38 = arith.subf %37, %36 : vector<3x512xf32>
    %cst_14 = arith.constant 2.000000e+00 : f32
    %39 = vector.broadcast %cst_14 : f32 to vector<3x512xf32>
    %40 = arith.mulf %39, %33 : vector<3x512xf32>
    %41 = arith.mulf %40, %38 : vector<3x512xf32>
    %cst_15 = arith.constant 2.000000e+00 : f32
    %42 = vector.broadcast %cst_15 : f32 to vector<3x512xf32>
    %43 = arith.mulf %42, %33 : vector<3x512xf32>
    %44 = arith.mulf %43, %33 : vector<3x512xf32>
    %cst_16 = arith.constant 1.000000e+00 : f32
    %45 = vector.broadcast %cst_16 : f32 to vector<3x512xf32>
    %46 = arith.subf %45, %44 : vector<3x512xf32>
    %47 = tpu.concatenate %0, %3, %6, %9, %14, %17, %22, %25, %30, %33, %38, %41, %46 in 0 : vector<3x512xf32>, vector<3x512xf32>, vector<3x512xf32>, vector<3x512xf32>, vector<3x512xf32>, vector<3x512xf32>, vector<3x512xf32>, vector<3x512xf32>, vector<3x512xf32>, vector<3x512xf32>, vector<3x512xf32>, vector<3x512xf32>, vector<3x512xf32> -> vector<39x512xf32>
    %c0_17 = arith.constant 0 : index
    %c0_18 = arith.constant 0 : index
    %48 = vector.load %arg2[%c0_17, %c0_18] : memref<39x512xf32, #tpu.memory_space<vmem>>, vector<39x512xf32>
    tpu.vector_store %arg2[%c0_17, %c0_18], %47 {strides = array<i32>} : memref<39x512xf32, #tpu.memory_space<vmem>>, vector<39x512xf32>,
    return
  }
  func.func @transform_0(%arg0: i32) -> (i32, i32) {
    %c0_i32 = arith.constant 0 : i32
    %c0_i32_0 = arith.constant 0 : i32
    return %c0_i32, %arg0 : i32, i32
  }
  func.func @transform_1(%arg0: i32) -> (i32, i32) {
    %c0_i32 = arith.constant 0 : i32
    %c0_i32_0 = arith.constant 0 : i32
    return %c0_i32, %arg0 : i32, i32
  }
}

</mosaic_0001>

<bundles_post_ra>
// kernel: tpu_custom_call.1
= control target key start
LH: loop header
LB: loop body
LE: loop exit
PB: predicated region body
PF: predicated region fallthrough
CT: control target
= control target key end

     0   :  { %6 = vsyncpa [#allocation3], 0  ;;  %s1439_s0 = inlined_call_operand.hbm [shape: f32[3,1024], index: 0, kind: input, shape index: {}]   ;;  %s1440_s1 = inlined_call_operand.hbm [shape: f32[39,1024], index: 1, kind: output, shape index: {}]  }
   0x1   :  { %8 = vsyncpa [#allocation3 + $0x1], 0 }
   0x2   :  { %9 = vsyncpa [#allocation4], 0 }
   0x3   :  { %11 = vsyncpa [#allocation4 + $0x1], 0  ;;  %s1104_s6 = smov 0   ;;  %s1106_s7 = smov 0  }
   0x4   :  { %s1108_s8 = smov 0   ;;  %s1110_s9 = smov 0  }
   0x5 LB: > { %s1125_s10 = sadd.s32 4294967295, %s1081_s9   ;;  %s881_s11 = sadd.s32 4294967294, %s1081_s9   ;;  %s1081_s9 = sphi %s1110_s9, %s1455_s9   ;;  %s1077_s8 = sphi %s1108_s8, %s1454_s8   ;;  %s1073_s7 = sphi %s1106_s7, %s1453_s7   ;;  %s1069_s6 = sphi %s1104_s6, %s1452_s6  }
   0x6   : > { %s1129_s12 = sadd.s32 1, %s1081_s9   ;;  %s24_s13 = sadd.s32 1, %s1077_s8 }
   0x7   : > { %s21_s14 = ssub.s32 %s1081_s9, %s1129_s12  ;;  %p31_p0 = scmp.ne.s32.totalorder %s1077_s8, %s1073_s7 }
   0x8   : > { %p22_p1 = scmp.eq.s32.totalorder %s21_s14, 0  ;;  %p32_p2 = scmp.eq.s32.totalorder %s1081_s9, 0 }
   0x9   : > { %p37_p3 = scmp.ne.s32.totalorder %s1073_s7, %s1069_s6  ;;  %p38_p4 = scmp.eq.s32.totalorder %s1125_s10, 0 }
   0xa   : > { %s1141_s15 = scalar_select %p22_p1, %s1077_s8, %s24_s13  }
   0xb   : > { %p1143_p5 = por %p32_p2, %p31_p0  ;;  %p1147_p6 = por %p38_p4, %p37_p3 }
   0xc   : > { %p61_p7 = scmp.eq.s32.totalorder %s1125_s10, 1  ;;  %p67_p8 = scmp.eq.s32.totalorder %s881_s11, 1 }
   0xd   : > { %p932_p10 = scmp.lt.s32.totalorder %s1081_s9, 2  ;;  %s87_s20 = sand.u32 1, %s1077_s8  }
   0xe   : > { %p1154_p11 = por %p61_p7, %p31_p0  ;;  %p1158_p12 = por %p67_p8, %p37_p3 }
   0xf   : > { %s909_s21 = sshll.u32 %s1081_s9, 8  ;;  %s884_s22 = sshll.u32 %s87_s20, 4 }
  0x10   : > { %s1444_s18 = scalar_select %p1154_p11, 1, 0 }
  0x11   : > { %s1445_s19 = scalar_select %p1158_p12, 1, 0 }
  0x12   : > { %s1167_s25 = scalar_lea.hbm %s1439_s0, %s909_s21  ;;  %s91_s26 = scalar_lea.vmem [#allocation2], %s884_s22 }
  0x13   : > { %s99_s27 = sshll.u32 %s91_s26, 4  ;;  %p1171_p13 = pnand %p932_p10, %p1143_p5  ;;  %s1175_s27 = int_to_ptr.vmem [resolvable:$true] %s99_s27 }
  0x14   : > { %s88_s29 = scalar_lea.sflag [#allocation3], %s87_s20  ;;  %s985_s30 = scalar_lea.hbm %s1167_s25, 256 }
  0x15   : > { %p986_p2 = scmp.ne.s32.totalorder %s1167_s25, %s985_s30  ;;  %p987_p3 = pneg %p1171_p13 }
  0x16   : > { %s990_s4 = scalar_lea.hbm %s1439_s0, 512  ;;  %p991_p5 = scmp.lt.u32.totalorder %s1167_s25, %s1439_s0 }
  0x17   : > { %p988_p4 = pnand %p987_p3, %p986_p2  ;;  %p992_p8 = scmp.lt.u32.totalorder %s990_s4, %s985_s30 }
  0x18   : > { %p994_p9 = scmp.lt.u32.totalorder %s985_s30, %s1167_s25 }
  0x19   : > { %p989_p7 = pneg %p988_p4  ;;  %p993_p10 = por %p992_p8, %p991_p5 }
  0x1b   : > { %p995_p0 = por %p994_p9, %p993_p10 }
  0x1d   : > { %p996_p1 = pnand %p995_p0, %p989_p7 }
  0x1f   : > { %999 = shalt.err (!%p996_p1)
}
  0x20   : > { %s1000_s13 = scalar_lea.vmem %s1175_s27, 256  ;;  %s1083_s14 = smov [#allocation2]  }
  0x21   : > { %p1001_p2 = scmp.ne.s32.totalorder %s1175_s27, %s1000_s13  ;;  %s1005_s16 = sshll.u32 %s1083_s14, 4  ;;  %s1006_s16 = int_to_ptr.vmem [resolvable:$false] %s1005_s16 }
  0x22   : > { %s1007_s20 = scalar_lea.vmem %s1006_s16, 512  ;;  %p1008_p11 = scmp.lt.s32.totalorder %s1175_s27, %s1006_s16 }
  0x23   : > { %p1003_p4 = pnand %p1001_p2, %p987_p3  ;;  %p1009_p5 = scmp.lt.s32.totalorder %s1007_s20, %s1000_s13 }
  0x25   : > { %p1004_p12 = pneg %p1003_p4  ;;  %p1010_p8 = por %p1009_p5, %p1008_p11 }
  0x27   : > { %p1011_p9 = pnand %p1010_p8, %p1004_p12 }
  0x29   : > { %1014 = shalt.err (!%p1011_p9)
}
  0x2a   : > { %927 = dma.hbm_to_vmem [thread:$0]  (!%p1171_p13), %s1167_s25, 256, %s1175_s27, %s88_s29  }
  0x2b   : > { %p1447_p0 = scmp.lt.s32.totalorder %s1081_s9, 3  ;;  %p1448_p1 = scmp.ge.s32.totalorder %s1081_s9, 1 }
  0x2d   : > { %p105_p3 = pnand %p1448_p1, %p1447_p0 }
  0x2e   : > { %s1209_s21 = sand.u32 (!%p105_p3), 1, %s1073_s7  }
  0x2f   : > { %108 = sbr.rel (%p105_p3) target bundleno = 199 (0xc7), region = 24  ;;  %s888_s22 = sshll.u32 (!%p105_p3), %s1209_s21, 4 }
  0x30   : > { %s111_s23 = scalar_lea.sflag (!%p105_p3), [#allocation3], %s1209_s21  ;;  %s114_s24 = scalar_lea.vmem (!%p105_p3), [#allocation2], %s888_s22 }
  0x36   : > { %1060 = dma.done.wait (%p1147_p6), %s111_s23, 256  }
  0x37   : > { %1062 = vsyncadd (%p1147_p6), %s111_s23, 4294967040  ;;  %v1217_v0 = vld [vmem:[%s114_s24] sm:$0x77]  ;;  %v1219_v1 = vld [vmem:[%s114_s24 + $0x8] sm:$0x77]  ;;  %s911_s17 = smul.u32 160, %s1209_s21 }
  0x38   : > { %v137_v2 = vand.u32 2147483647, %v1217_v0  ;;  %v140_v3 = vand.u32 2139095040, %v1217_v0  ;;  %v241_v4 = vand.u32 2147483647, %v1219_v1  ;;  %v244_v5 = vand.u32 2139095040, %v1219_v1 }
  0x39   : > { %v1084_v24 = vmov 683565275   ;;  %v1085_v26 = vmov 2475754826   ;;  %v1086_v28 = vmov 2131351028  }
  0x3a   : > { %v141_v6 = vshrl.u32 %v140_v3, 23  ;;  %v144_v7 = vand.u32 8388607, %v137_v2  ;;  %v245_v8 = vshrl.u32 %v244_v5, 23  ;;  %v248_v9 = vand.u32 8388607, %v241_v4 }
  0x3b   : > { %v1087_v30 = vmov 2102212464   ;;  %v1088_v32 = vmov 920167782   ;;  %v1089_v40 = vmov 1326507024  }
  0x3c   : > { %v889_v10 = vadd.s32 4294967169, %v141_v6  ;;  %v893_v11 = vadd.s32 4294967169, %v245_v8  ;;  %v145_v13 = vor.u32 8388608, %v144_v7  ;;  %v249_v14 = vor.u32 8388608, %v248_v9  ;;  %s1299_s25 = scalar_lea.vmem [#allocation5], %s911_s17  ;;  %s910_s26 = sshll.u32 %s1125_s10, 9 }
  0x3d   : > { %vm139_vm14 = vcmp.lt.s32.totalorder %v1217_v0, 0  ;;  %vm138_vm15 = vcmp.le.f32.partialorder %v137_v2, 0.7853982  ;;  %s808_s27 = sshll.u32 %s1299_s25, 4  ;;  %s1388_s30 = scalar_lea.hbm %s1440_s1, %s910_s26  ;;  %s1390_s27 = int_to_ptr.vmem [resolvable:$true] %s808_s27 }
  0x3e   : > { %v147_v12 = vadd.s32 1, %v889_v10  ;;  %v251_v15 = vadd.s32 1, %v893_v11  ;;  %v1229_v20 = vshll.u32 %v145_v13, 8  ;;  %v1231_v22 = vshll.u32 %v249_v14, 8  ;;  %s795_s10 = scalar_lea.sflag [#allocation4], %s1209_s21  ;;  %s1015_s2 = scalar_lea.vmem %s1390_s27, 2560 }
  0x3f   : > { %p1016_p6 = scmp.ne.s32.totalorder %s1390_s27, %s1015_s2  ;;  %p1449_p11 = scmp.ne.s32.totalorder %s1444_s18, 0 }
  0x40   : > { %vm148_vm0 = vcmp.gt.s32.totalorder %v147_v12, 0  ;;  %vm252_vm1 = vcmp.gt.s32.totalorder %v251_v15, 0  ;;  %s1090_s3 = smov [#allocation5]  }
  0x41   : > { %v149_v16 = vsel %vm148_vm0, %v147_v12, 0  ;;  %v253_v19 = vsel %vm252_vm1, %v251_v15, 0  ;;  %vm243_vm0 = vcmp.lt.s32.totalorder %v1219_v1, 0  ;;  %vm242_vm1 = vcmp.le.f32.partialorder %v241_v4, 0.7853982  ;;  %p1017_p12 = pnand %p1016_p6, %p1449_p11  ;;  %s1019_s4 = sshll.u32 %s1090_s3, 4  ;;  %s1020_s4 = int_to_ptr.vmem [resolvable:$false] %s1019_s4 }
  0x42   : > { %v150_v17 = vshrl.u32 %v149_v16, 5  ;;  %v151_v18 = vand.u32 31, %v149_v16  ;;  %v255_v21 = vand.u32 31, %v253_v19  ;;  %v1233_v34 = vshrl.u32 %v253_v19, 5  ;;  %s1021_s5 = scalar_lea.vmem %s1020_s4, 5120  ;;  %p1022_p7 = scmp.lt.s32.totalorder %s1390_s27, %s1020_s4 }
  0x43   : > { %p1018_p13 = pneg %p1017_p12  ;;  %p1023_p10 = scmp.lt.s32.totalorder %s1021_s5, %s1015_s2 }
  0x44   : > { %v152_v23 = vsub.s32 32, %v151_v18  ;;  %v154_v25 = vshll.u32 %v1084_v24, %v151_v18  ;;  %v157_v27 = vshll.u32 %v1085_v26, %v151_v18  ;;  %v160_v29 = vshll.u32 %v1086_v28, %v151_v18 }
  0x45   : > { %v163_v31 = vshll.u32 %v1087_v30, %v151_v18  ;;  %v166_v33 = vshll.u32 %v1088_v32, %v151_v18  ;;  %vm169_vm2 = vcmp.lt.s32.totalorder %v150_v17, 1  ;;  %vm170_vm3 = vcmp.lt.s32.totalorder %v150_v17, 2  ;;  %p1024_p2 = por %p1023_p10, %p1022_p7 }
  0x46   : > { %v153_v35 = vshrl.u32 %v1084_v24, %v152_v23  ;;  %v155_v36 = vshrl.u32 %v1085_v26, %v152_v23  ;;  %v158_v37 = vshrl.u32 %v1086_v28, %v152_v23  ;;  %v161_v38 = vshrl.u32 %v1087_v30, %v152_v23 }
  0x47   : > { %v164_v39 = vshrl.u32 %v1088_v32, %v152_v23  ;;  %v167_v41 = vshrl.u32 %v1089_v40, %v152_v23  ;;  %vm172_vm4 = vcmp.lt.s32.totalorder %v150_v17, 4  ;;  %v256_v45 = vsub.s32 32, %v255_v21  ;;  %p1025_p4 = pnand %p1024_p2, %p1018_p13 }
  0x48   : > { %v156_v42 = vor.u32 %v155_v36, %v154_v25  ;;  %v159_v43 = vor.u32 %v158_v37, %v157_v27  ;;  %v162_v44 = vor.u32 %v161_v38, %v160_v29  ;;  %vm171_vm5 = vcmp.lt.s32.totalorder %v150_v17, 3 }
  0x49   : > { %v165_v46 = vor.u32 %v164_v39, %v163_v31  ;;  %v168_v47 = vor.u32 %v167_v41, %v166_v33  ;;  %v258_v48 = vshll.u32 %v1084_v24, %v255_v21  ;;  %v261_v56 = vshll.u32 %v1085_v26, %v255_v21 }
  0x4a   : > { %v173_v49 = vsel %vm169_vm2, %v153_v35, %v156_v42  ;;  %v174_v50 = vsel %vm172_vm4, %v162_v44, 2102212464  ;;  %v177_v51 = vsel %vm169_vm2, %v156_v42, %v159_v43  ;;  %v181_v52 = vsel %vm169_vm2, %v159_v43, %v162_v44 }
  0x4b   : > { %v175_v53 = vsel %vm171_vm5, %v159_v43, %v174_v50  ;;  %v178_v54 = vsel %vm172_vm4, %v165_v46, 920167782  ;;  %v182_v55 = vsel %vm172_vm4, %v168_v47, 1326507024  ;;  %v257_v59 = vshrl.u32 %v1084_v24, %v256_v45 }
  0x4c   : > { %v179_v57 = vsel %vm171_vm5, %v162_v44, %v178_v54  ;;  %v183_v58 = vsel %vm171_vm5, %v165_v46, %v182_v55  ;;  %v259_v60 = vshrl.u32 %v1085_v26, %v256_v45  ;;  %v176_v61 = vsel %vm170_vm3, %v173_v49, %v175_v53 }
  0x4d   : > { %v180_v62 = vsel %vm170_vm3, %v177_v51, %v179_v57  ;;  %v184_v63 = vsel %vm170_vm3, %v181_v52, %v183_v58  ;;  %v262_v3 = vshrl.u32 %v1086_v28, %v256_v45  ;;  %v264_v11 = vshll.u32 %v1086_v28, %v255_v21 }
  0x4e   : > { %v1242_v5 = vmul.u32.u64.low %v1229_v20, %v184_v63  ;;  %v1243_v6 = vmul.u32.u64.high %v1229_v20, %v184_v63, %v1242_v5  ;;  %v1246_v7 = vmul.u32.u64.low %v1229_v20, %v180_v62  ;;  %v1247_v8 = vmul.u32.u64.high %v1229_v20, %v180_v62, %v1246_v7 }
  0x4f   : > { %v260_v9 = vor.u32 %v259_v60, %v258_v48  ;;  %v263_v10 = vor.u32 %v262_v3, %v261_v56  ;;  %v265_v12 = vshrl.u32 %v1087_v30, %v256_v45  ;;  %v267_v13 = vshll.u32 %v1087_v30, %v255_v21 }
  0x50   : > { %v268_v14 = vshrl.u32 %v1088_v32, %v256_v45  ;;  %v270_v15 = vshll.u32 %v1088_v32, %v255_v21  ;;  %v271_v16 = vshrl.u32 %v1089_v40, %v256_v45  ;;  %v192_v17 = vmul.u32 %v1229_v20, %v176_v61 }
  0x51   : > { %v266_v18 = vor.u32 %v265_v12, %v264_v11  ;;  %vm273_vm6 = vcmp.lt.s32.totalorder %v1233_v34, 1  ;;  %vm274_vm7 = vcmp.lt.s32.totalorder %v1233_v34, 2  ;;  %vm194_vm8 = vc.u32 %v1243_v6, %v1246_v7 }
  0x52   : > { %v195_v19 = vadd.s32 1, %v1247_v8  ;;  %v269_v23 = vor.u32 %v268_v14, %v267_v13  ;;  %vm275_vm9 = vcmp.lt.s32.totalorder %v1233_v34, 3  ;;  %v272_v24 = vor.u32 %v271_v16, %v270_v15 }
  0x53   : > { %vm276_vm10 = vcmp.lt.s32.totalorder %v1233_v34, 4  ;;  %v277_v25 = vsel %vm273_vm6, %v257_v59, %v260_v9  ;;  %v281_v21 = vsel %vm273_vm6, %v260_v9, %v263_v10  ;;  %v285_v28 = vsel %vm273_vm6, %v263_v10, %v266_v18 }
  0x54   : > { %v196_v26 = vsel %vm194_vm8, %v195_v19, %v1247_v8  ;;  %v278_v20 = vsel %vm276_vm10, %v266_v18, 2102212464  ;;  %v282_v27 = vsel %vm276_vm10, %v269_v23, 920167782  ;;  %v286_v32 = vsel %vm276_vm10, %v272_v24, 1326507024 }
  0x55   : > { %v197_v29 = vadd.s32 %v196_v26, %v192_v17  ;;  %v279_v30 = vsel %vm275_vm9, %v263_v10, %v278_v20  ;;  %v283_v31 = vsel %vm275_vm9, %v266_v18, %v282_v27  ;;  %v287_v36 = vsel %vm275_vm9, %v269_v23, %v286_v32 }
  0x56   : > { %v280_v33 = vsel %vm274_vm7, %v277_v25, %v279_v30  ;;  %v284_v35 = vsel %vm274_vm7, %v281_v21, %v283_v31  ;;  %v288_v38 = vsel %vm274_vm7, %v285_v28, %v287_v36  ;;  %v193_v57 = vadd.s32 %v1246_v7, %v1243_v6 }
  0x57   : > { %v198_v37 = vadd.s32 536870912, %v197_v29  ;;  %v1264_v39 = vmul.u32.u64.low %v1231_v22, %v284_v35  ;;  %v1265_v40 = vmul.u32.u64.high %v1231_v22, %v284_v35, %v1264_v39  ;;  %v296_v44 = vmul.u32 %v1231_v22, %v280_v33 }
  0x58   : > { %v1268_v41 = vmul.u32.u64.low %v1231_v22, %v288_v38  ;;  %v1269_v42 = vmul.u32.u64.high %v1231_v22, %v288_v38, %v1268_v41  ;;  %vm723_vm2 = vcmask 1042432   ;;  %vm728_vm7 = vcmask 1045504  }
  0x59   : > { %v199_v43 = vshrl.u32 %v198_v37, 30  ;;  %v299_v46 = vadd.s32 1, %v1265_v40  ;;  %vm229_vm10 = vweird.f32 %v1217_v0 }
  0x5a   : > { %vm298_vm11 = vc.u32 %v1269_v42, %v1264_v39  ;;  %v297_v13 = vadd.s32 %v1264_v39, %v1269_v42 }
  0x5b   : > { %v200_v45 = vshll.u32 %v199_v43, 30  ;;  %v300_v34 = vsel %vm298_vm11, %v299_v46, %v1265_v40  ;;  %v223_v6 = vsub.s32 4, %v199_v43  ;;  %vm733_vm11 = vcmask 1040384  }
  0x5c   : > { %v301_v48 = vadd.s32 %v300_v34, %v296_v44 }
  0x5d   : > { %v201_v47 = vsub.s32 %v197_v29, %v200_v45  ;;  %v224_v25 = vsel %vm139_vm14, %v223_v6, %v199_v43 }
  0x5e   : > { %v302_v50 = vadd.s32 536870912, %v301_v48  ;;  %v226_v28 = vsel %vm138_vm15, 0, %v224_v25 }
  0x5f   : > { %v203_v49 = vsub.s32 0, %v201_v47  ;;  %v230_v33 = vadd.s32 3, %v226_v28  ;;  %v438_v38 = vand.u32 3, %v226_v28 }
  0x60   : > { %v303_v52 = vshrl.u32 %v302_v50, 30  ;;  %v593_v50 = vcombine.high %v1217_v0, %v1217_v0 }
  0x61   : > { %v890_v51 = vmin.u32 %v203_v49, %v201_v47  ;;  %v231_v37 = vand.u32 3, %v230_v33  ;;  %vm443_vm4 = vcmp.eq.s32.totalorder %v438_v38, 2  ;;  %vm440_vm6 = vcmp.eq.s32.totalorder %v438_v38, 0 }
  0x62   : > { %v304_v54 = vshll.u32 %v303_v52, 30  ;;  %v327_v31 = vsub.s32 4, %v303_v52  ;;  %vm439_vm9 = vcmp.lt.s32.totalorder %v438_v38, 2 }
  0x63   : > { %v205_v53 = vclz %v890_v51  ;;  %vm236_vm3 = vcmp.eq.s32.totalorder %v231_v37, 2  ;;  %vm233_vm5 = vcmp.eq.s32.totalorder %v231_v37, 0  ;;  %vm232_vm8 = vcmp.lt.s32.totalorder %v231_v37, 2 }
  0x64   : > { %v305_v56 = vsub.s32 %v301_v48, %v304_v54  ;;  %v328_v36 = vsel %vm243_vm0, %v327_v31, %v303_v52  ;;  %v594_v54 = vcombine.high %v1219_v1, %v1219_v1 }
  0x65   : > { %v891_v55 = vadd.s32 4294967294, %v205_v53  ;;  %v330_v40 = vsel %vm242_vm1, 0, %v328_v36 }
  0x66   : > { %v307_v58 = vsub.s32 0, %v305_v56  ;;  %v334_v43 = vadd.s32 3, %v330_v40  ;;  %v541_v46 = vand.u32 3, %v330_v40 }
  0x67   : > { %vm892_vm12 = vcmp.lt.s32.totalorder %v891_v55, 0 }
  0x68   : > { %v208_v22 = vsel %vm892_vm12, 0, %v891_v55  ;;  %v894_v62 = vmin.u32 %v307_v58, %v305_v56  ;;  %v335_v51 = vand.u32 3, %v334_v43  ;;  %vm738_vm12 = vcmask 1043456  }
  0x69   : > { %v209_v59 = vsub.s32 32, %v208_v22  ;;  %v210_v60 = vshll.u32 %v201_v47, %v208_v22  ;;  %v213_v61 = vsub.s32 4294967266, %v208_v22 }
  0x6a   : > { %v309_v5 = vclz %v894_v62 }
  0x6b   : > { %v211_v63 = vshrl.u32 %v193_v57, %v209_v59  ;;  %v214_v3 = vadd.s32 127, %v213_v61 }
  0x6c   : > { %v895_v10 = vadd.s32 4294967294, %v309_v5 }
  0x6d   : > { %v212_v8 = vor.u32 %v211_v63, %v210_v60  ;;  %v215_v9 = vshll.u32 %v214_v3, 23 }
  0x6e   : > { %vm896_vm13 = vcmp.lt.s32.totalorder %v895_v10, 0 }
  0x6f   : > { %v216_v11 = vor.u32 4788187, %v215_v9  ;;  %v219_v12 = vcvt.s32.f32 %v212_v8  ;;  %v312_v7 = vsel %vm896_vm13, 0, %v895_v10  ;;  %vm333_vm13 = vweird.f32 %v1219_v1 }
  0x70   : > { %v313_v15 = vsub.s32 32, %v312_v7  ;;  %v314_v16 = vshll.u32 %v305_v56, %v312_v7  ;;  %v317_v17 = vsub.s32 4294967266, %v312_v7 }
  0x71   : > { %v217_v14 = vand.u32 2147483647, %v216_v11 }
  0x72   : > { %v315_v19 = vshrl.u32 %v297_v13, %v313_v15  ;;  %v318_v23 = vadd.s32 127, %v317_v17 }
  0x73   : > { %v220_v18 = vmul.f32 %v219_v12, %v217_v14 }
  0x74   : > { %v316_v21 = vor.u32 %v315_v19, %v314_v16  ;;  %v319_v26 = vshll.u32 %v318_v23, 23 }
  0x75   : > { %v221_v24 = vxor.u32 2147483648, %v220_v18 }
  0x76   : > { %v320_v29 = vor.u32 4788187, %v319_v26  ;;  %v323_v30 = vcvt.s32.f32 %v316_v21 }
  0x77   : > { %v222_v20 = vsel %vm139_vm14, %v221_v24, %v220_v18  ;;  %vm542_vm14 = vcmp.lt.s32.totalorder %v541_v46, 2 }
  0x78   : > { %v225_v27 = vsel %vm138_vm15, %v1217_v0, %v222_v20  ;;  %v321_v32 = vand.u32 2147483647, %v320_v29  ;;  %vm543_vm15 = vcmp.eq.s32.totalorder %v541_v46, 0 }
  0x79   : > { %977 = vcosq.f32 %v225_v27 }
  0x7a   : > { %979 = vsinq.f32 %v225_v27  ;;  %v324_v35 = vmul.f32 %v323_v30, %v321_v32 }
  0x7c   : > { %v325_v2 = vxor.u32 2147483648, %v324_v35 }
  0x7e   : > { %v326_v39 = vsel %vm243_vm0, %v325_v2, %v324_v35  ;;  %vm743_vm0 = vcmask 1046528  }
  0x7f   : > { %v329_v41 = vsel %vm242_vm1, %v1219_v1, %v326_v39  ;;  %vm546_vm1 = vcmp.eq.s32.totalorder %v541_v46, 2 }
  0x80   : > { %981 = vcosq.f32 %v329_v41 }
  0x81   : > { %983 = vsinq.f32 %v329_v41 }
  0x83   : > { %v978_v42 = vpop.eup %977 }
  0x84   : > { %v980_v44 = vpop.eup %979  ;;  %v237_v45 = vxor.u32 2147483648, %v978_v42 }
  0x85   : > { %v234_v4 = vxor.u32 2147483648, %v980_v44 }
  0x86   : > { %v238_v47 = vsel %vm236_vm3, %v237_v45, %v980_v44  ;;  %v445_v34 = vsel %vm443_vm4, %v237_v45, %v980_v44  ;;  %vm336_vm3 = vcmp.lt.s32.totalorder %v335_v51, 2  ;;  %vm340_vm4 = vcmp.eq.s32.totalorder %v335_v51, 2 }
  0x87   : > { %v235_v48 = vsel %vm233_vm5, %v978_v42, %v234_v4  ;;  %v442_v49 = vsel %vm440_vm6, %v978_v42, %v234_v4  ;;  %vm337_vm5 = vcmp.eq.s32.totalorder %v335_v51, 0  ;;  %vm748_vm6 = vcmask 1041408  }
  0x88   : > { %v239_v52 = vsel %vm232_vm8, %v235_v48, %v238_v47  ;;  %v446_v53 = vsel %vm439_vm9, %v442_v49, %v445_v34  ;;  %vm753_vm8 = vcmask 1044480  }
  0x89   : > { %v240_v55 = vsel %vm229_vm10, nan, %v239_v52  ;;  %v447_v56 = vsel %vm229_vm10, nan, %v446_v53 }
  0x8a   : > { %v551_v57 = vmul.f32 2.0, %v240_v55  ;;  %v601_v22 = vrot.slane %v240_v55, 5  ;;  %v599_v58 = vcombine.high %v240_v55, %v240_v55  ;;  %v613_v59 = vrot.slane %v447_v56, 2  ;;  %v982_v61 = vpop.eup %981 }
  0x8b   : > { %v611_v60 = vcombine.high %v447_v56, %v447_v56  ;;  %v984_v8 = vpop.eup %983  ;;  %v341_v11 = vxor.u32 2147483648, %v982_v61 }
  0x8c   : > { %v1292_v62 = vmul.f32 %v551_v57, %v447_v56  ;;  %v724_v63 = vsel %vm723_vm2, %v1217_v0, %v601_v22  ;;  %v602_v3 = vrot.slane %v599_v58, 5  ;;  %v555_v5 = vmul.f32 %v551_v57, %v240_v55 }
  0x8d   : > { %v729_v9 = vsel %vm728_vm7, %v724_v63, %v613_v59  ;;  %v614_v10 = vrot.slane %v611_v60, 2  ;;  %v338_v13 = vxor.u32 2147483648, %v984_v8  ;;  %v342_v7 = vsel %vm340_vm4, %v341_v11, %v984_v8 }
  0x8e   : > { %774 = vst [vmem:[%s1299_s25] sm:$0xff] %v729_v9  ;;  %v725_v12 = vsel %vm723_vm2, %v593_v50, %v602_v3  ;;  %v557_v14 = vsub.f32 1.0, %v555_v5  ;;  %v559_v0 = vmul.f32 2.0, %v1292_v62  ;;  %v548_v15 = vsel %vm546_vm1, %v341_v11, %v984_v8 }
  0x8f   : > { %v730_v6 = vsel %vm728_vm7, %v725_v12, %v614_v10  ;;  %v625_v16 = vrot.slane %v1292_v62, 7  ;;  %v339_v17 = vsel %vm337_vm5, %v982_v61, %v338_v13  ;;  %v545_v18 = vsel %vm543_vm15, %v982_v61, %v338_v13 }
  0x90   : > { %775 = vst [vmem:[%s1299_s25 + $0x8] sm:$0xff] %v730_v6  ;;  %v1310_v19 = vmul.f32 %v559_v0, %v557_v14  ;;  %v635_v23 = vcombine.low %v557_v14, %v557_v14  ;;  %v343_v24 = vsel %vm336_vm3, %v339_v17, %v342_v7  ;;  %v549_v25 = vsel %vm542_vm14, %v545_v18, %v548_v15 }
  0x91   : > { %v734_v21 = vsel %vm733_vm11, %v613_v59, %v625_v16  ;;  %v623_v26 = vcombine.high %v1292_v62, %v1292_v62  ;;  %v344_v20 = vsel %vm333_vm13, nan, %v343_v24  ;;  %v550_v27 = vsel %vm333_vm13, nan, %v549_v25 }
  0x92   : > { %v643_v28 = vrot.slane %v1310_v19, 1  ;;  %v739_v29 = vsel %vm738_vm12, %v734_v21, %v635_v23  ;;  %v552_v30 = vmul.f32 2.0, %v344_v20  ;;  %v603_v31 = vrot.slane %v344_v20, 5 }
  0x93   : > { %v615_v32 = vrot.slane %v550_v27, 2  ;;  %v600_v33 = vcombine.high %v344_v20, %v344_v20  ;;  %v612_v35 = vcombine.high %v550_v27, %v550_v27  ;;  %v626_v2 = vrot.slane %v623_v26, 7 }
  0x94   : > { %v744_v36 = vsel %vm743_vm0, %v739_v29, %v643_v28  ;;  %v641_v37 = vcombine.high %v1310_v19, %v1310_v19  ;;  %v554_v38 = vmul.f32 %v552_v30, %v550_v27  ;;  %v726_v39 = vsel %vm723_vm2, %v1219_v1, %v603_v31 }
  0x95   : > { %v604_v40 = vrot.slane %v600_v33, 5  ;;  %778 = vst [vmem:[%s1299_s25 + $0x20] sm:$0xff] %v744_v36  ;;  %v556_v41 = vmul.f32 %v552_v30, %v344_v20  ;;  %v731_v42 = vsel %vm728_vm7, %v726_v39, %v615_v32  ;;  %v616_v43 = vrot.slane %v612_v35, 2 }
  0x96   : > { %v644_v44 = vrot.slane %v641_v37, 1  ;;  %v735_v45 = vsel %vm733_vm11, %v614_v10, %v626_v2  ;;  %776 = vst [vmem:[%s1299_s25 + $0x10] sm:$0xff] %v731_v42  ;;  %v560_v34 = vmul.f32 2.0, %v554_v38  ;;  %v627_v50 = vrot.slane %v554_v38, 7 }
  0x97   : > { %v727_v4 = vsel %vm723_vm2, %v594_v54, %v604_v40  ;;  %v740_v46 = vsel %vm738_vm12, %v735_v45, %v557_v14  ;;  %v558_v47 = vsub.f32 1.0, %v556_v41  ;;  %v624_v51 = vcombine.high %v554_v38, %v554_v38 }
  0x98   : > { %v732_v48 = vsel %vm728_vm7, %v727_v4, %v616_v43  ;;  %v745_v49 = vsel %vm743_vm0, %v740_v46, %v644_v44  ;;  %v563_v55 = vmul.f32 %v559_v0, %v1292_v62  ;;  %v567_v1 = vmul.f32 2.0, %v1310_v19 }
  0x99   : > { %777 = vst [vmem:[%s1299_s25 + $0x18] sm:$0xff] %v732_v48  ;;  %779 = vst [vmem:[%s1299_s25 + $0x28] sm:$0xff] %v745_v49  ;;  %v562_v52 = vmul.f32 %v560_v34, %v558_v47  ;;  %v636_v53 = vcombine.low %v558_v47, %v558_v47  ;;  %v736_v54 = vsel %vm733_vm11, %v615_v32, %v627_v50  ;;  %v628_v56 = vrot.slane %v624_v51, 7 }
  0x9a   : > { %v564_v57 = vmul.f32 %v560_v34, %v554_v38  ;;  %v565_v60 = vsub.f32 1.0, %v563_v55  ;;  %v571_v62 = vmul.f32 %v567_v1, %v1310_v19 }
  0x9b   : > { %v645_v22 = vrot.slane %v562_v52, 1  ;;  %v741_v58 = vsel %vm738_vm12, %v736_v54, %v636_v53  ;;  %v642_v59 = vcombine.high %v562_v52, %v562_v52  ;;  %v737_v61 = vsel %vm733_vm11, %v616_v43, %v628_v56 }
  0x9c   : > { %v566_v63 = vsub.f32 1.0, %v564_v57  ;;  %v568_v3 = vmul.f32 2.0, %v562_v52  ;;  %v742_v9 = vsel %vm738_vm12, %v737_v61, %v558_v47  ;;  %v569_v10 = vmul.f32 %v567_v1, %v565_v60 }
  0x9d   : > { %v746_v5 = vsel %vm743_vm0, %v741_v58, %v645_v22  ;;  %v646_v8 = vrot.slane %v642_v59, 1  ;;  %v655_v11 = vrot.slane %v565_v60, 6  ;;  %v653_v12 = vcombine.high %v565_v60, %v565_v60 }
  0x9e   : > { %780 = vst [vmem:[%s1299_s25 + $0x30] sm:$0xff] %v746_v5  ;;  %v570_v13 = vmul.f32 %v568_v3, %v566_v63  ;;  %v657_v14 = vrot.slane %v566_v63, 6  ;;  %v667_v6 = vrot.slane %v569_v10, 3  ;;  %v665_v7 = vcombine.high %v569_v10, %v569_v10 }
  0x9f   : > { %v747_v0 = vsel %vm743_vm0, %v742_v9, %v646_v8  ;;  %v654_v15 = vcombine.high %v566_v63, %v566_v63  ;;  %v749_v16 = vsel %vm748_vm6, %v643_v28, %v655_v11  ;;  %v656_v17 = vrot.slane %v653_v12, 6 }
  0xa0   : > { %781 = vst [vmem:[%s1299_s25 + $0x38] sm:$0xff] %v747_v0  ;;  %v669_v18 = vrot.slane %v570_v13, 3  ;;  %v751_v19 = vsel %vm748_vm6, %v645_v22, %v657_v14  ;;  %v754_v23 = vsel %vm753_vm8, %v749_v16, %v667_v6  ;;  %v668_v24 = vrot.slane %v665_v7, 3 }
  0xa1   : > { %v658_v25 = vrot.slane %v654_v15, 6  ;;  %v666_v21 = vcombine.high %v570_v13, %v570_v13  ;;  %782 = vst [vmem:[%s1299_s25 + $0x40] sm:$0xff] %v754_v23  ;;  %v750_v26 = vsel %vm748_vm6, %v644_v44, %v656_v17  ;;  %v573_v27 = vsub.f32 1.0, %v571_v62 }
  0xa2   : > { %v756_v20 = vsel %vm753_vm8, %v751_v19, %v669_v18  ;;  %v575_v29 = vmul.f32 2.0, %v569_v10  ;;  %v755_v28 = vsel %vm753_vm8, %v750_v26, %v668_v24  ;;  %v572_v32 = vmul.f32 %v568_v3, %v562_v52 }
  0xa3   : > { %784 = vst [vmem:[%s1299_s25 + $0x50] sm:$0xff] %v756_v20  ;;  %v670_v30 = vrot.slane %v666_v21, 3  ;;  %v752_v31 = vsel %vm748_vm6, %v646_v8, %v658_v25  ;;  %783 = vst [vmem:[%s1299_s25 + $0x48] sm:$0xff] %v755_v28  ;;  %v576_v36 = vmul.f32 2.0, %v570_v13  ;;  %v677_v37 = vcombine.high %v573_v27, %v573_v27 }
  0xa4   : > { %v577_v33 = vmul.f32 %v575_v29, %v573_v27  ;;  %v579_v35 = vmul.f32 %v575_v29, %v569_v10  ;;  %v574_v38 = vsub.f32 1.0, %v572_v32 }
  0xa5   : > { %v757_v2 = vsel %vm753_vm8, %v752_v31, %v670_v30  ;;  %v580_v42 = vmul.f32 %v576_v36, %v570_v13 }
  0xa6   : > { %785 = vst [vmem:[%s1299_s25 + $0x58] sm:$0xff] %v757_v2  ;;  %v581_v39 = vsub.f32 1.0, %v579_v35  ;;  %v685_v40 = vrot.slane %v577_v33, 5  ;;  %v683_v41 = vcombine.high %v577_v33, %v577_v33  ;;  %v578_v43 = vmul.f32 %v576_v36, %v574_v38 }
  0xa7   : > { %v678_v44 = vcombine.high %v574_v38, %v574_v38  ;;  %v583_v45 = vmul.f32 2.0, %v577_v33  ;;  %v582_v48 = vsub.f32 1.0, %v580_v42 }
  0xa8   : > { %v697_v4 = vrot.slane %v581_v39, 2  ;;  %v758_v46 = vsel %vm723_vm2, %v573_v27, %v685_v40  ;;  %v686_v47 = vrot.slane %v683_v41, 5  ;;  %v695_v34 = vcombine.high %v581_v39, %v581_v39 }
  0xa9   : > { %v687_v49 = vrot.slane %v578_v43, 5  ;;  %v684_v50 = vcombine.high %v578_v43, %v578_v43  ;;  %v585_v51 = vmul.f32 %v583_v45, %v581_v39  ;;  %v587_v1 = vmul.f32 %v583_v45, %v577_v33 }
  0xaa   : > { %v762_v52 = vsel %vm728_vm7, %v758_v46, %v697_v4  ;;  %v698_v53 = vrot.slane %v695_v34, 2  ;;  %v759_v55 = vsel %vm723_vm2, %v677_v37, %v686_v47  ;;  %v699_v54 = vrot.slane %v582_v48, 2 }
  0xab   : > { %786 = vst [vmem:[%s1299_s25 + $0x60] sm:$0xff] %v762_v52  ;;  %v760_v56 = vsel %vm723_vm2, %v574_v38, %v687_v49  ;;  %v688_v57 = vrot.slane %v684_v50, 5  ;;  %v696_v22 = vcombine.high %v582_v48, %v582_v48  ;;  %v589_v59 = vsub.f32 1.0, %v587_v1 }
  0xac   : > { %v763_v58 = vsel %vm728_vm7, %v759_v55, %v698_v53  ;;  %v709_v60 = vrot.slane %v585_v51, 7  ;;  %v707_v61 = vcombine.high %v585_v51, %v585_v51  ;;  %v764_v63 = vsel %vm728_vm7, %v760_v56, %v699_v54 }
  0xad   : > { %787 = vst [vmem:[%s1299_s25 + $0x68] sm:$0xff] %v763_v58  ;;  %v700_v3 = vrot.slane %v696_v22, 2  ;;  %v761_v62 = vsel %vm723_vm2, %v678_v44, %v688_v57  ;;  %v584_v5 = vmul.f32 2.0, %v578_v43  ;;  %788 = vst [vmem:[%s1299_s25 + $0x70] sm:$0xff] %v764_v63  ;;  %v719_v8 = vcombine.low %v589_v59, %v589_v59 }
  0xae   : > { %v766_v9 = vsel %vm733_vm11, %v697_v4, %v709_v60  ;;  %v710_v10 = vrot.slane %v707_v61, 7 }
  0xaf   : > { %v765_v11 = vsel %vm728_vm7, %v761_v62, %v700_v3  ;;  %v586_v12 = vmul.f32 %v584_v5, %v582_v48  ;;  %v588_v13 = vmul.f32 %v584_v5, %v578_v43  ;;  %v770_v14 = vsel %vm738_vm12, %v766_v9, %v719_v8 }
  0xb0   : > { %789 = vst [vmem:[%s1299_s25 + $0x78] sm:$0xff] %v765_v11  ;;  %v767_v0 = vsel %vm733_vm11, %v698_v53, %v710_v10  ;;  %790 = vst [vmem:[%s1299_s25 + $0x80] sm:$0x7f] %v770_v14 }
  0xb1   : > { %v771_v6 = vsel %vm738_vm12, %v767_v0, %v589_v59  ;;  %v590_v7 = vsub.f32 1.0, %v588_v13  ;;  %v711_v15 = vrot.slane %v586_v12, 7  ;;  %v708_v16 = vcombine.high %v586_v12, %v586_v12 }
  0xb2   : > { %791 = vst [vmem:[%s1299_s25 + $0x88] sm:$0x7f] %v771_v6 }
  0xb3   : > { %v720_v17 = vcombine.low %v590_v7, %v590_v7  ;;  %v768_v18 = vsel %vm733_vm11, %v699_v54, %v711_v15  ;;  %v712_v19 = vrot.slane %v708_v16, 7 }
  0xb5   : > { %v772_v23 = vsel %vm738_vm12, %v768_v18, %v720_v17  ;;  %v769_v24 = vsel %vm733_vm11, %v700_v3, %v712_v19 }
  0xb6   : > { %792 = vst [vmem:[%s1299_s25 + $0x90] sm:$0x7f] %v772_v23  ;;  %v773_v25 = vsel %vm738_vm12, %v769_v24, %v590_v7 }
  0xb7   : > { %793 = vst [vmem:[%s1299_s25 + $0x98] sm:$0x7f] %v773_v25 }
  0xb8   : > { %1028 = shalt.err (!%p1025_p4)
}
  0xb9   : > { %s1029_s11 = scalar_lea.hbm %s1388_s30, 2560  ;;  %s1033_s16 = scalar_lea.hbm %s1440_s1, 5120 }
  0xba   : > { %p1030_p5 = scmp.ne.s32.totalorder %s1388_s30, %s1029_s11  ;;  %p1034_p0 = scmp.lt.u32.totalorder %s1388_s30, %s1440_s1 }
  0xbb   : > { %p1035_p1 = scmp.lt.u32.totalorder %s1033_s16, %s1029_s11  ;;  %p1037_p6 = scmp.lt.u32.totalorder %s1029_s11, %s1388_s30 }
  0xbc   : > { %p1031_p8 = pnand %p1030_p5, %p1449_p11 }
  0xbd   : > { %p1036_p3 = por %p1035_p1, %p1034_p0 }
  0xbe   : > { %p1032_p9 = pneg %p1031_p8 }
  0xbf   : > { %p1038_p12 = por %p1037_p6, %p1036_p3 }
  0xc1   : > { %p1039_p13 = pnand %p1038_p12, %p1032_p9 }
  0xc3   : > { %1042 = shalt.err (!%p1039_p13)
}
  0xc4   : > { %s1091_s23 = smov 512   ;;  %s1092_s24 = smov 1024  }
  0xc5   : > { %s1093_s17 = smov 32  }
  0xc6   : > { %922 = dma.vmem_to_hbm [thread:$0]  (%p1449_p11), %s1390_s27, 2560, %s1388_s30, %s795_s10, %s1091_s23, %s1092_s24, %s1093_s17  }
  0xc7 PF: > { %s823_s25 = sand.u32 1, %s1069_s6   ;;  %p1450_p7 = scmp.ne.s32.totalorder %s1445_s19, 0 }
  0xc8   : > { %p1451_p10 = scmp.ge.s32.totalorder %s1081_s9, 2  ;;  %s824_s26 = scalar_lea.sflag [#allocation4], %s823_s25 }
  0xca   : > { %p929_p2 = pnand %p1451_p10, %p1450_p7 }
  0xcc   : > { %1064 = dma.done.wait (!%p929_p2), %s824_s26, 2560  }
  0xcd   : > { %1066 = vsyncadd (!%p929_p2), %s824_s26, 4294964736  ;;  %p14_p4 = scmp.ge.s32.totalorder %s1129_s12, 4   ;;  %s1452_s6 = smov %s1073_s7 }
  0xce   : > { %s1453_s7 = smov %s1077_s8  ;;  %s1454_s8 = smov %s1141_s15 }
  0xcf   : > { %s1455_s9 = smov %s1129_s12  ;;  %16 = sbr.rel (!%p14_p4) target bundleno = 5 (0x5), region = 69 }
  0xd6   :  { %829 = vsyncpa [#allocation3], 1 }
  0xd7   :  { %831 = vsyncpa [#allocation3 + $0x1], 1 }
  0xd8   :  { %832 = vsyncpa [#allocation4], 1 }
  0xd9   :  { %834 = vsyncpa [#allocation4 + $0x1], 1 }

</bundles_post_ra>
